<compile_context>
chip_gen: v7x
topology: tpu7x:2x2x1
jax: 0.10.0
libtpu: 0.0.40
codegen_flags: <defaults>
</compile_context>

<pallas_src>
import functools

import jax
import jax.numpy as jnp
from jax.experimental import pallas as pl
from jax.experimental.pallas import tpu as pltpu

FP_DIM = 2048     # Morgan fingerprint length (nn.Linear(2048, 100))
EMB_DIM = 100     # embedding width of ligand_mlp / product_mlp
PAD_EMB = 128     # embedding width zero-padded to a full lane tile
MAX_TILE_N = 512  # product rows streamed per grid step


def _round_up(x, m):
    return (x + m - 1) // m * m


def _logits_kernel(prod_fp_ref, wp_ref, bp_ref, wo_ref, out_ref, *,
                   n_total, tile_n):
    """Per-block product logits: relu(fp @ Wp^T + bp) . wo -> lane-dense (1, tile_n)."""
    i = pl.program_id(0)

    # product branch: relu(product_fps @ Wp^T + bp)  -> (tile_n, 128), f32 accum
    prod_emb = jnp.maximum(
        jnp.dot(prod_fp_ref[...], wp_ref[...],
                preferred_element_type=jnp.float32) + bp_ref[...],
        0.0)

    # Contract the 128-wide embedding axis against the output weights.  wo is
    # zero-padded to (8, 128) (only row 0 is real) so the matmul is
    # sublane-aligned and the result is a lane-dense logits row.
    logits8 = jax.lax.dot_general(
        wo_ref[...], prod_emb,
        dimension_numbers=(((1,), (1,)), ((), ())),
        preferred_element_type=jnp.float32)            # (8, tile_n)
    logits = logits8[0:1, :]                           # (1, tile_n)

    # Mask rows past the real product count so they contribute exp(-inf) = 0.
    col = jax.lax.broadcasted_iota(jnp.int32, (1, tile_n), 1) + i * tile_n
    out_ref[...] = jnp.where(col < n_total, logits, -jnp.inf)


def _softmax_kernel(logits_ref, log_ref, prob_ref):
    """log_softmax / softmax over the lane axis of a (1, n_pad) logits row."""
    x = logits_ref[...]
    m = jnp.max(x, axis=-1, keepdims=True)
    shifted = x - m
    e = jnp.exp(shifted)
    s = jnp.sum(e, axis=-1, keepdims=True)
    log_ref[...] = shifted - jnp.log(s)
    prob_ref[...] = e * pl.reciprocal(s, approx=True)


def ligand2d_product(ligand_fp, product_fps, params):
    """Pallas forward pass of Ligand2D_product.

    Returns (log_softmax(logits), softmax(logits)), each of shape (n,).

    The ligand embedding and the output bias add one scalar to every logit;
    softmax/log_softmax are invariant to that shift, so those terms are dropped
    on device -- the outputs are identical to the original module.
    """
    wl, bl, wp, bp, wo, bo = params
    del ligand_fp, wl, bl, bo  # constant shift under softmax -- see docstring

    n = product_fps.shape[0]
    tile_n = min(MAX_TILE_N, _round_up(n, 8))
    n_pad = _round_up(n, tile_n)
    num_blocks = n_pad // tile_n

    # Wrapper-side layout plumbing (cheap, one-time):
    #  * fingerprints: pad rows to n_pad, cast to bf16 (values are exact 0/1)
    #  * Wp: transpose to (2048, emb), zero-pad emb 100->128, cast to bf16
    #  * bias / output weights: zero-pad to 128 lanes (f32)
    prod_bf = jnp.pad(product_fps, ((0, n_pad - n), (0, 0))).astype(jnp.bfloat16)
    wp_t = jnp.pad(wp.T, ((0, 0), (0, PAD_EMB - EMB_DIM))).astype(jnp.bfloat16)
    bp_p = jnp.pad(bp.reshape(1, EMB_DIM), ((0, 0), (0, PAD_EMB - EMB_DIM)))
    wo_p = jnp.pad(wo[:, EMB_DIM:], ((0, 7), (0, PAD_EMB - EMB_DIM)))  # (8, 128)

    flops = 2 * n_pad * FP_DIM * PAD_EMB + 2 * n_pad * PAD_EMB * 8
    bytes_accessed = (n_pad * FP_DIM * 2        # bf16 fingerprint stream
                      + FP_DIM * PAD_EMB * 2    # bf16 Wp (resident)
                      + 9 * PAD_EMB * 4         # bias + output weights
                      + n_pad * 4)              # logits out

    logits_blocks = pl.pallas_call(
        functools.partial(_logits_kernel, n_total=n, tile_n=tile_n),
        out_shape=jax.ShapeDtypeStruct((num_blocks, tile_n), jnp.float32),
        grid=(num_blocks,),
        in_specs=[
            pl.BlockSpec((tile_n, FP_DIM), lambda i: (i, 0)),   # streamed rows
            pl.BlockSpec((FP_DIM, PAD_EMB), lambda i: (0, 0)),  # resident Wp
            pl.BlockSpec((1, PAD_EMB), lambda i: (0, 0)),       # resident bias
            pl.BlockSpec((8, PAD_EMB), lambda i: (0, 0)),       # resident wo
        ],
        out_specs=pl.BlockSpec((1, tile_n), lambda i: (i, 0)),
        compiler_params=pltpu.CompilerParams(
            dimension_semantics=("parallel",)),
        cost_estimate=pl.CostEstimate(flops=flops, transcendentals=0,
                                      bytes_accessed=bytes_accessed),
    )(prod_bf, wp_t, bp_p, wo_p)

    # Final softmax over all n products (only n floats) in a tiny second pass.
    logits_row = logits_blocks.reshape(1, n_pad)
    vmem = pl.BlockSpec(memory_space=pltpu.MemorySpace.VMEM)
    log_row, prob_row = pl.pallas_call(
        _softmax_kernel,
        out_shape=(jax.ShapeDtypeStruct((1, n_pad), jnp.float32),
                   jax.ShapeDtypeStruct((1, n_pad), jnp.float32)),
        in_specs=[vmem],
        out_specs=(vmem, vmem),
    )(logits_row)

    return log_row[0, :n], prob_row[0, :n]


def init_params(key):
    """PyTorch-layout params, nn.Linear default init: uniform(+/- 1/sqrt(fan_in))."""
    ks = jax.random.split(key, 6)
    b_fp = 1.0 / (FP_DIM ** 0.5)
    b_cat = 1.0 / ((2 * EMB_DIM) ** 0.5)
    wl = jax.random.uniform(ks[0], (EMB_DIM, FP_DIM), jnp.float32, -b_fp, b_fp)
    bl = jax.random.uniform(ks[1], (EMB_DIM,), jnp.float32, -b_fp, b_fp)
    wp = jax.random.uniform(ks[2], (EMB_DIM, FP_DIM), jnp.float32, -b_fp, b_fp)
    bp = jax.random.uniform(ks[3], (EMB_DIM,), jnp.float32, -b_fp, b_fp)
    wo = jax.random.uniform(ks[4], (1, 2 * EMB_DIM), jnp.float32, -b_cat, b_cat)
    bo = jax.random.uniform(ks[5], (1,), jnp.float32, -b_cat, b_cat)
    return (wl, bl, wp, bp, wo, bo)


if __name__ == "__main__":
    key = jax.random.PRNGKey(0)
    k_lig, k_prod, k_params = jax.random.split(key, 3)

    n_products = 8
    # Synthetic Morgan-fingerprint bit vectors (0/1 floats), stand-ins for smiles2fp.
    ligand_fp = (jax.random.uniform(k_lig, (1, FP_DIM)) < 0.1).astype(jnp.float32)
    product_fps = (jax.random.uniform(k_prod, (n_products, FP_DIM)) < 0.1
                   ).astype(jnp.float32)

    params = init_params(k_params)

    log_out, prob_out = ligand2d_product(ligand_fp, product_fps, params)
    jax.block_until_ready((log_out, prob_out))

    # Pure-JAX reference of the ORIGINAL module (ligand branch + output bias
    # included).  Their contribution is a constant shift over the softmax axis
    # and cancels, so the kernel (which omits them) must agree.
    wl, bl, wp, bp, wo, bo = params
    wp_bf = wp.astype(jnp.bfloat16).astype(jnp.float32)  # kernel streams bf16 weights
    lig_emb = jnp.maximum(ligand_fp @ wl.T + bl, 0.0)                # (1, 100)
    prod_emb = jnp.maximum(product_fps @ wp_bf.T + bp, 0.0)          # (n, 100)
    logits = (prod_emb @ wo[:, EMB_DIM:].T
              + lig_emb @ wo[:, :EMB_DIM].T + bo).reshape(-1)        # (n,)
    ref_log = jax.nn.log_softmax(logits)
    ref_prob = jax.nn.softmax(logits)

    assert log_out.shape == (n_products,) and prob_out.shape == (n_products,)
    assert jnp.allclose(log_out, ref_log, atol=1e-3), "log_softmax mismatch"
    assert jnp.allclose(prob_out, ref_prob, atol=1e-3), "softmax mismatch"

    print("KERNEL_OK")
</pallas_src>

<mosaic_0001>
module attributes {stable_mosaic.version = 11 : i64} {
  func.func @_logits_kernel(%arg0: i32, %arg1: memref<8x2048xbf16, #tpu.memory_space<vmem>>, %arg2: memref<2048x128xbf16, #tpu.memory_space<vmem>>, %arg3: memref<1x128xf32, #tpu.memory_space<vmem>>, %arg4: memref<8x128xf32, #tpu.memory_space<vmem>>, %arg5: memref<1x8xf32, #tpu.memory_space<vmem>>) attributes {dimension_semantics = [#tpu.dimension_semantics<parallel>], iteration_bounds = array<i64: 1>, scalar_prefetch = 0 : i64, scratch_operands = 0 : i64, tpu.core_type = #tpu.core_type<tc>, window_params = [{transform_indices = @transform_0, window_bounds = array<i64: 8, 2048>}, {pipeline_mode = #tpu.pipeline_mode<synchronous>, transform_indices = @transform_1, window_bounds = array<i64: 2048, 128>}, {pipeline_mode = #tpu.pipeline_mode<synchronous>, transform_indices = @transform_2, window_bounds = array<i64: 1, 128>}, {pipeline_mode = #tpu.pipeline_mode<synchronous>, transform_indices = @transform_3, window_bounds = array<i64: 8, 128>}, {transform_indices = @transform_4, window_bounds = array<i64: 1, 8>}]} {
    %c0 = arith.constant 0 : index
    %c0_0 = arith.constant 0 : index
    %0 = vector.load %arg1[%c0, %c0_0] : memref<8x2048xbf16, #tpu.memory_space<vmem>>, vector<8x2048xbf16>
    %c0_1 = arith.constant 0 : index
    %c0_2 = arith.constant 0 : index
    %1 = vector.load %arg2[%c0_1, %c0_2] : memref<2048x128xbf16, #tpu.memory_space<vmem>>, vector<2048x128xbf16>
    %cst = arith.constant dense<0.000000e+00> : vector<8x128xf32>
    %2 = tpu.matmul %0, %1, %cst {dimension_numbers = #tpu.dot_dimension_numbers<[1], [0], [0], [1], [0, 0, 1, 1], [], []>} : vector<8x2048xbf16>, vector<2048x128xbf16>, vector<8x128xf32> -> vector<8x128xf32>
    %c0_3 = arith.constant 0 : index
    %c0_4 = arith.constant 0 : index
    %3 = vector.load %arg3[%c0_3, %c0_4] : memref<1x128xf32, #tpu.memory_space<vmem>>, vector<1x128xf32>
    %4 = vector.broadcast %3 : vector<1x128xf32> to vector<8x128xf32>
    %5 = arith.addf %2, %4 : vector<8x128xf32>
    %cst_5 = arith.constant 0.000000e+00 : f32
    %6 = vector.broadcast %cst_5 : f32 to vector<8x128xf32>
    %7 = arith.maximumf %5, %6 : vector<8x128xf32>
    %c0_6 = arith.constant 0 : index
    %c0_7 = arith.constant 0 : index
    %8 = vector.load %arg4[%c0_6, %c0_7] : memref<8x128xf32, #tpu.memory_space<vmem>>, vector<8x128xf32>
    %cst_8 = arith.constant dense<0.000000e+00> : vector<8x8xf32>
    %9 = tpu.matmul %8, %7, %cst_8 {dimension_numbers = #tpu.dot_dimension_numbers<[1], [1], [0], [0], [0, 0, 1, 0], [], []>} : vector<8x128xf32>, vector<8x128xf32>, vector<8x8xf32> -> vector<8x8xf32>
    %10 = vector.extract_strided_slice %9 {offsets = [0, 0], sizes = [1, 8], strides = [1, 1]} : vector<8x8xf32> to vector<1x8xf32>
    %11 = tpu.iota {dimensions = array<i32: 1>} : vector<1x8xi32>
    %c8_i32 = arith.constant 8 : i32
    %12 = arith.muli %arg0, %c8_i32 : i32
    %13 = vector.broadcast %12 : i32 to vector<1x8xi32>
    %14 = arith.addi %11, %13 : vector<1x8xi32>
    %c8_i32_9 = arith.constant 8 : i32
    %15 = vector.broadcast %c8_i32_9 : i32 to vector<1x8xi32>
    %16 = arith.cmpi slt, %14, %15 : vector<1x8xi32>
    %cst_10 = arith.constant 0xFF800000 : f32
    %17 = vector.broadcast %cst_10 : f32 to vector<1x8xf32>
    %18 = arith.select %16, %10, %17 : vector<1x8xi1>, vector<1x8xf32>
    %c0_11 = arith.constant 0 : index
    %c0_12 = arith.constant 0 : index
    %19 = vector.load %arg5[%c0_11, %c0_12] : memref<1x8xf32, #tpu.memory_space<vmem>>, vector<1x8xf32>
    tpu.vector_store %arg5[%c0_11, %c0_12], %18 {strides = array<i32>} : memref<1x8xf32, #tpu.memory_space<vmem>>, vector<1x8xf32>,
    return
  }
  func.func @transform_0(%arg0: i32) -> (i32, i32) {
    %c0_i32 = arith.constant 0 : i32
    %c0_i32_0 = arith.constant 0 : i32
    return %arg0, %c0_i32 : i32, i32
  }
  func.func @transform_1(%arg0: i32) -> (i32, i32) {
    %c0_i32 = arith.constant 0 : i32
    %c0_i32_0 = arith.constant 0 : i32
    %c0_i32_1 = arith.constant 0 : i32
    return %c0_i32, %c0_i32_0 : i32, i32
  }
  func.func @transform_2(%arg0: i32) -> (i32, i32) {
    %c0_i32 = arith.constant 0 : i32
    %c0_i32_0 = arith.constant 0 : i32
    %c0_i32_1 = arith.constant 0 : i32
    return %c0_i32, %c0_i32_0 : i32, i32
  }
  func.func @transform_3(%arg0: i32) -> (i32, i32) {
    %c0_i32 = arith.constant 0 : i32
    %c0_i32_0 = arith.constant 0 : i32
    %c0_i32_1 = arith.constant 0 : i32
    return %c0_i32, %c0_i32_0 : i32, i32
  }
  func.func @transform_4(%arg0: i32) -> (i32, i32) {
    %c0_i32 = arith.constant 0 : i32
    %c0_i32_0 = arith.constant 0 : i32
    return %arg0, %c0_i32 : i32, i32
  }
}

</mosaic_0001>

<bundles_post_ra>
// kernel: tpu_custom_call.1
= control target key start
LH: loop header
LB: loop body
LE: loop exit
PB: predicated region body
PF: predicated region fallthrough
CT: control target
= control target key end

     0   :  { %9 = vsyncpa [#allocation3], 0  ;;  %s2189_s0 = inlined_call_operand.hbm [shape: bf16[8,2048], index: 0, kind: input, shape index: {}]   ;;  %s2190_s1 = inlined_call_operand.hbm [shape: bf16[2048,128], index: 1, kind: input, shape index: {}]   ;;  %s2191_s2 = inlined_call_operand.vmem [shape: f32[1,128], index: 2, kind: input, shape index: {}]   ;;  %s2192_s3 = inlined_call_operand.vmem [shape: f32[8,128], index: 3, kind: input, shape index: {}]   ;;  %s2193_s4 = inlined_call_operand.hbm [shape: f32[1,8], index: 4, kind: output, shape index: {}]  }
   0x1   :  { %10 = vsyncpa [#allocation6], 0 }
   0x2   :  { %11 = vsyncpa [#allocation4], 0  ;;  %s2108_s15 = smov [#allocation2]   ;;  %s2109_s17 = smov [#allocation5]  }
   0x3   :  { %s18_s16 = sshll.u32 %s2108_s15, 4  ;;  %s27_s18 = sshll.u32 %s2109_s17, 4  ;;  %s19_s16 = int_to_ptr.vmem [resolvable:$true] %s18_s16  ;;  %s2140_s18 = int_to_ptr.vmem [resolvable:$true] %s27_s18 }
   0x4   :  { %s2036_s21 = scalar_lea.hbm %s2189_s0, 1024 }
   0x5   :  { %p2037_p0 = scmp.ne.s32.totalorder %s2189_s0, %s2036_s21  ;;  %p2040_p1 = scmp.lt.u32.totalorder %s2036_s21, %s2189_s0 }
   0x7   :  { %p2042_p2 = pnand %p2040_p1, %p2037_p0 }
   0x9   :  { %2045 = shalt.err (!%p2042_p2)
}
   0xa   :  { %s2046_s26 = scalar_lea.vmem %s19_s16, 1024  ;;  %p2051_p4 = scmp.lt.s32.totalorder %s19_s16, %s19_s16 }
   0xb   :  { %p2047_p3 = scmp.ne.s32.totalorder %s19_s16, %s2046_s26  ;;  %p2052_p5 = scmp.lt.s32.totalorder %s2046_s26, %s2046_s26 }
   0xd   :  { %p2053_p6 = por %p2052_p5, %p2051_p4 }
   0xf   :  { %p2054_p7 = pnand %p2053_p6, %p2047_p3 }
  0x11   :  { %2057 = shalt.err (!%p2054_p7)
}
  0x12   :  { %21 = dma.hbm_to_vmem [thread:$0]  %s2189_s0, 1024, %s19_s16, [#allocation3]  }
  0x13   :  { %s2058_s5 = scalar_lea.hbm %s2190_s1, 16384 }
  0x14   :  { %p2059_p8 = scmp.ne.s32.totalorder %s2190_s1, %s2058_s5  ;;  %p2062_p9 = scmp.lt.u32.totalorder %s2058_s5, %s2190_s1 }
  0x16   :  { %p2064_p10 = pnand %p2062_p9, %p2059_p8 }
  0x18   :  { %2067 = shalt.err (!%p2064_p10)
}
  0x19   :  { %s2068_s10 = scalar_lea.vmem %s2140_s18, 16384  ;;  %p2073_p12 = scmp.lt.s32.totalorder %s2140_s18, %s2140_s18 }
  0x1a   :  { %p2069_p11 = scmp.ne.s32.totalorder %s2140_s18, %s2068_s10  ;;  %p2074_p13 = scmp.lt.s32.totalorder %s2068_s10, %s2068_s10 }
  0x1c   :  { %p2075_p0 = por %p2074_p13, %p2073_p12 }
  0x1e   :  { %p2076_p1 = pnand %p2075_p0, %p2069_p11 }
  0x20   :  { %2079 = shalt.err (!%p2076_p1)
}
  0x21   :  { %s2110_s0 = smov 64   ;;  %s2111_s11 = smov 4  }
  0x22   :  { %33 = dma.hbm_to_vmem [thread:$0]  %s2190_s1, 16384, %s2140_s18, [#allocation6], %s2110_s0, %s2110_s0, %s2111_s11  }
  0x23   :  { %2102 = dma.done.wait [#allocation3], 1024  }
  0x24   :  { %2103 = vsyncadd [#allocation3], 4294966272 }
  0x25   :  { %2104 = dma.done.wait [#allocation6], 16384  }
  0x26   :  { %2105 = vsyncadd [#allocation6], 4294950912  ;;  %v1892_v0 = vld [vmem:[#allocation5 + $0x40] sm:$0xff]   ;;  %v1896_v4 = vld [vmem:[#allocation5 + $0x48] sm:$0xff]   ;;  %vm2113_vm0 = vmmov 0   ;;  %s2114_s16 = smov [#allocation7]  }
  0x27   :  { %v1893_v1 = vld [vmem:[#allocation5 + $0xc0] sm:$0xff]   ;;  %1702 = vmatprep.subr.bf16.mxu0 %v1892_v0  ;;  %v1897_v5 = vld [vmem:[#allocation5 + $0xc8] sm:$0xff]   ;;  %v1900_v8 = vld [vmem:[#allocation5 + $0x50] sm:$0xff]   ;;  %s1547_s17 = sshll.u32 %s2114_s16, 4  ;;  %vm1539_vm2 = vcmask 57344   ;;  %s1548_s17 = int_to_ptr.vmem [resolvable:$true] %s1547_s17 }
  0x28   :  { %v1894_v2 = vld [vmem:[#allocation5] sm:$0xff]   ;;  %1724 = vmatprep.subr.bf16.mxu1 %v1893_v1  ;;  %v1898_v6 = vld [vmem:[#allocation5 + $0x8] sm:$0xff]   ;;  %v1901_v9 = vld [vmem:[#allocation5 + $0xd0] sm:$0xff]   ;;  %s2080_s18 = scalar_lea.vmem %s1548_s17, 16  ;;  %s2084_s19 = scalar_lea.vmem %s1548_s17, 32 }
  0x29   :  { %v1895_v3 = vld [vmem:[#allocation5 + $0x80] sm:$0xff]   ;;  %1703 = vmatpush3.bf16.msra.mxu0 %v1894_v2  ;;  %v1899_v7 = vld [vmem:[#allocation5 + $0x88] sm:$0xff]   ;;  %v1902_v10 = vld [vmem:[#allocation5 + $0x10] sm:$0xff]   ;;  %p2081_p2 = scmp.ne.s32.totalorder %s1548_s17, %s2080_s18  ;;  %p2085_p3 = scmp.lt.s32.totalorder %s1548_s17, %s1548_s17 }
  0x2a   :  { %1725 = vmatpush3.bf16.msra.mxu1 %v1895_v3  ;;  %1704 = vmatprep.subr.bf16.mxu0 %v1896_v4  ;;  %v1903_v11 = vld [vmem:[#allocation5 + $0x90] sm:$0xff]   ;;  %v1904_v12 = vld [vmem:[#allocation5 + $0x58] sm:$0xff]   ;;  %v1908_v16 = vld [vmem:[#allocation5 + $0x60] sm:$0xff]   ;;  %p2086_p4 = scmp.lt.s32.totalorder %s2084_s19, %s2080_s18 }
  0x2b   :  { %1726 = vmatprep.subr.bf16.mxu1 %v1897_v5  ;;  %v1905_v13 = vld [vmem:[#allocation5 + $0xd8] sm:$0xff]   ;;  %v1909_v17 = vld [vmem:[#allocation5 + $0xe0] sm:$0xff]   ;;  %v1912_v20 = vld [vmem:[#allocation5 + $0x68] sm:$0xff]  }
  0x2c   :  { %v1906_v14 = vld [vmem:[#allocation5 + $0x18] sm:$0xff]   ;;  %v1910_v18 = vld [vmem:[#allocation5 + $0x20] sm:$0xff]   ;;  %v1913_v21 = vld [vmem:[#allocation5 + $0xe8] sm:$0xff]   ;;  %p2087_p5 = por %p2086_p4, %p2085_p3 }
  0x2d   :  { %1705 = vmatpush3.bf16.msra.mxu0 %v1898_v6  ;;  %v1907_v15 = vld [vmem:[#allocation5 + $0x98] sm:$0xff]   ;;  %v1911_v19 = vld [vmem:[#allocation5 + $0xa0] sm:$0xff]   ;;  %v1914_v22 = vld [vmem:[#allocation5 + $0x28] sm:$0xff]  }
  0x2e   :  { %1727 = vmatpush3.bf16.msra.mxu1 %v1899_v7  ;;  %1706 = vmatprep.subr.bf16.mxu0 %v1900_v8  ;;  %v1915_v23 = vld [vmem:[#allocation5 + $0xa8] sm:$0xff]   ;;  %v1916_v24 = vld [vmem:[#allocation5 + $0x70] sm:$0xff]   ;;  %v1920_v28 = vld [vmem:[#allocation5 + $0x78] sm:$0xff]   ;;  %p2088_p6 = pnand %p2087_p5, %p2081_p2 }
  0x2f   :  { %1728 = vmatprep.subr.bf16.mxu1 %v1901_v9  ;;  %v1917_v25 = vld [vmem:[#allocation5 + $0xf0] sm:$0xff]   ;;  %v1921_v29 = vld [vmem:[#allocation5 + $0xf8] sm:$0xff]   ;;  %v45_v32 = vld [vmem:[#allocation2] sm:$0xff] }
  0x30   :  { %v1918_v26 = vld [vmem:[#allocation5 + $0x30] sm:$0xff]   ;;  %v1922_v30 = vld [vmem:[#allocation5 + $0x38] sm:$0xff]   ;;  %v46_v33 = vld [vmem:[#allocation2 + $0x8] sm:$0xff]  ;;  %v1558_v34 = vcombine.low %v45_v32, %v45_v32  ;;  %v1559_v35 = vcombine.high %v45_v32, %v45_v32 }
  0x31   :  { %1707 = vmatpush3.bf16.msra.mxu0 %v1902_v10  ;;  %v1919_v27 = vld [vmem:[#allocation5 + $0xb0] sm:$0xff]   ;;  %v1923_v31 = vld [vmem:[#allocation5 + $0xb8] sm:$0xff]   ;;  %v1560_v36 = vcombine.low %v46_v33, %v46_v33  ;;  %v1561_v37 = vcombine.high %v46_v33, %v46_v33  ;;  %v1928_v38 = vld [vmem:[#allocation5 + $0x140] sm:$0xff]  }
  0x32   :  { %1729 = vmatpush3.bf16.msra.mxu1 %v1903_v11  ;;  %1708 = vmatprep.subr.bf16.mxu0 %v1904_v12  ;;  %v1929_v39 = vld [vmem:[#allocation5 + $0x1c0] sm:$0xff]   ;;  %v1932_v42 = vld [vmem:[#allocation5 + $0x148] sm:$0xff]   ;;  %v1936_v46 = vld [vmem:[#allocation5 + $0x150] sm:$0xff]  }
  0x33   :  { %1730 = vmatprep.subr.bf16.mxu1 %v1905_v13  ;;  %1172 = vmatprep.mubr.bf16.mxu0 %v1559_v35  ;;  %v1930_v40 = vld [vmem:[#allocation5 + $0x100] sm:$0xff]   ;;  %v1933_v43 = vld [vmem:[#allocation5 + $0x1c8] sm:$0xff]   ;;  %v1937_v47 = vld [vmem:[#allocation5 + $0x1d0] sm:$0xff]  }
  0x34   :  { %1212 = vmatprep.mubr.bf16.mxu1 %v1561_v37  ;;  %v1931_v41 = vld [vmem:[#allocation5 + $0x180] sm:$0xff]   ;;  %v1934_v44 = vld [vmem:[#allocation5 + $0x108] sm:$0xff]   ;;  %v1938_v48 = vld [vmem:[#allocation5 + $0x110] sm:$0xff]  }
  0x35   :  { %1709 = vmatpush3.bf16.msra.mxu0 %v1906_v14  ;;  %v1935_v45 = vld [vmem:[#allocation5 + $0x188] sm:$0xff]   ;;  %v1939_v49 = vld [vmem:[#allocation5 + $0x190] sm:$0xff]   ;;  %v1940_v50 = vld [vmem:[#allocation5 + $0x158] sm:$0xff]  }
  0x36   :  { %1731 = vmatpush3.bf16.msra.mxu1 %v1907_v15  ;;  %1710 = vmatprep.subr.bf16.mxu0 %v1908_v16  ;;  %v1941_v51 = vld [vmem:[#allocation5 + $0x1d8] sm:$0xff]   ;;  %v1944_v54 = vld [vmem:[#allocation5 + $0x160] sm:$0xff]   ;;  %v1948_v58 = vld [vmem:[#allocation5 + $0x168] sm:$0xff]  }
  0x37   :  { %1732 = vmatprep.subr.bf16.mxu1 %v1909_v17  ;;  %v1942_v52 = vld [vmem:[#allocation5 + $0x118] sm:$0xff]   ;;  %v1945_v55 = vld [vmem:[#allocation5 + $0x1e0] sm:$0xff]   ;;  %v1949_v59 = vld [vmem:[#allocation5 + $0x1e8] sm:$0xff]  }
  0x38   :  { %v1943_v53 = vld [vmem:[#allocation5 + $0x198] sm:$0xff]   ;;  %v1946_v56 = vld [vmem:[#allocation5 + $0x120] sm:$0xff]   ;;  %v1950_v60 = vld [vmem:[#allocation5 + $0x128] sm:$0xff]  }
  0x39   :  { %1711 = vmatpush3.bf16.msra.mxu0 %v1910_v18  ;;  %v1947_v57 = vld [vmem:[#allocation5 + $0x1a0] sm:$0xff]   ;;  %v1951_v61 = vld [vmem:[#allocation5 + $0x1a8] sm:$0xff]   ;;  %v1952_v62 = vld [vmem:[#allocation5 + $0x170] sm:$0xff]  }
  0x3a   :  { %1733 = vmatpush3.bf16.msra.mxu1 %v1911_v19  ;;  %1712 = vmatprep.subr.bf16.mxu0 %v1912_v20  ;;  %v1953_v63 = vld [vmem:[#allocation5 + $0x1f0] sm:$0xff]   ;;  %v1956_v2 = vld [vmem:[#allocation5 + $0x178] sm:$0xff]   ;;  %v1964_v12 = vld [vmem:[#allocation5 + $0x240] sm:$0xff]  }
  0x3b   :  { %1734 = vmatprep.subr.bf16.mxu1 %v1913_v21  ;;  %v1954_v0 = vld [vmem:[#allocation5 + $0x130] sm:$0xff]   ;;  %v1957_v3 = vld [vmem:[#allocation5 + $0x1f8] sm:$0xff]   ;;  %v1965_v13 = vld [vmem:[#allocation5 + $0x2c0] sm:$0xff]  }
  0x3c   :  { %v1955_v1 = vld [vmem:[#allocation5 + $0x1b0] sm:$0xff]   ;;  %v1958_v4 = vld [vmem:[#allocation5 + $0x138] sm:$0xff]   ;;  %v1966_v14 = vld [vmem:[#allocation5 + $0x200] sm:$0xff]  }
  0x3d   :  { %1713 = vmatpush3.bf16.msra.mxu0 %v1914_v22  ;;  %v1959_v5 = vld [vmem:[#allocation5 + $0x1b8] sm:$0xff]   ;;  %v47_v6 = vld [vmem:[#allocation2 + $0x10] sm:$0xff]  ;;  %v1967_v15 = vld [vmem:[#allocation5 + $0x280] sm:$0xff]  }
  0x3e   :  { %1735 = vmatpush3.bf16.msra.mxu1 %v1915_v23  ;;  %1714 = vmatprep.subr.bf16.mxu0 %v1916_v24  ;;  %v1562_v7 = vcombine.low %v47_v6, %v47_v6  ;;  %v1563_v8 = vcombine.high %v47_v6, %v47_v6  ;;  %v48_v9 = vld [vmem:[#allocation2 + $0x18] sm:$0xff]  ;;  %v1968_v16 = vld [vmem:[#allocation5 + $0x248] sm:$0xff]   ;;  %v1972_v20 = vld [vmem:[#allocation5 + $0x250] sm:$0xff]  }
  0x3f   :  { %1736 = vmatprep.subr.bf16.mxu1 %v1917_v25  ;;  %v1564_v10 = vcombine.low %v48_v9, %v48_v9  ;;  %v1565_v11 = vcombine.high %v48_v9, %v48_v9  ;;  %v1969_v17 = vld [vmem:[#allocation5 + $0x2c8] sm:$0xff]   ;;  %v1973_v21 = vld [vmem:[#allocation5 + $0x2d0] sm:$0xff]   ;;  %v1976_v24 = vld [vmem:[#allocation5 + $0x258] sm:$0xff]  }
  0x40   :  { %v1970_v18 = vld [vmem:[#allocation5 + $0x208] sm:$0xff]   ;;  %v1974_v22 = vld [vmem:[#allocation5 + $0x210] sm:$0xff]   ;;  %v1977_v25 = vld [vmem:[#allocation5 + $0x2d8] sm:$0xff]  }
  0x41   :  { %1715 = vmatpush3.bf16.msra.mxu0 %v1918_v26  ;;  %v1971_v19 = vld [vmem:[#allocation5 + $0x288] sm:$0xff]   ;;  %v1975_v23 = vld [vmem:[#allocation5 + $0x290] sm:$0xff]   ;;  %v1978_v26 = vld [vmem:[#allocation5 + $0x218] sm:$0xff]  }
  0x42   :  { %1737 = vmatpush3.bf16.msra.mxu1 %v1919_v27  ;;  %1716 = vmatprep.subr.bf16.mxu0 %v1920_v28  ;;  %v1979_v27 = vld [vmem:[#allocation5 + $0x298] sm:$0xff]   ;;  %v1980_v28 = vld [vmem:[#allocation5 + $0x260] sm:$0xff]   ;;  %v1984_v32 = vld [vmem:[#allocation5 + $0x268] sm:$0xff]  }
  0x43   :  { %1738 = vmatprep.subr.bf16.mxu1 %v1921_v29  ;;  %v1981_v29 = vld [vmem:[#allocation5 + $0x2e0] sm:$0xff]   ;;  %v1985_v33 = vld [vmem:[#allocation5 + $0x2e8] sm:$0xff]   ;;  %v1989_v37 = vld [vmem:[#allocation5 + $0x2f0] sm:$0xff]  }
  0x44   :  { %v1987_v35 = vld [vmem:[#allocation5 + $0x2a8] sm:$0xff]  }
  0x45   :  { %1717 = vmatpush3.bf16.msra.mxu0 %v1922_v30  ;;  %v1982_v30 = vld [vmem:[#allocation5 + $0x220] sm:$0xff]   ;;  %v2020_v6 = vld [vmem:[#allocation5 + $0x368] sm:$0xff]  }
  0x46   :  { %1739 = vmatpush3.bf16.msra.mxu1 %v1923_v31  ;;  %1746 = vmatprep.subr.bf16.mxu0 %v1928_v38  ;;  %v1983_v31 = vld [vmem:[#allocation5 + $0x2a0] sm:$0xff]   ;;  %v1990_v38 = vld [vmem:[#allocation5 + $0x230] sm:$0xff]   ;;  %v2023_v9 = vld [vmem:[#allocation5 + $0x3a8] sm:$0xff]  }
  0x47   :  { %1768 = vmatprep.subr.bf16.mxu1 %v1929_v39  ;;  %v1991_v39 = vld [vmem:[#allocation5 + $0x2b0] sm:$0xff]  }
  0x48   :  { %1173 = vmatmul.mubr.bf16.vlgmr.msra.gmra.mrb[0].mxu0 %v1558_v34  ;;  %v1986_v34 = vld [vmem:[#allocation5 + $0x228] sm:$0xff]  }
  0x49   :  { %1213 = vmatmul.mubr.bf16.vlgmr.msra.gmra.mrb[0].mxu1 %v1560_v36  ;;  %1747 = vmatpush3.bf16.msra.mxu0 %v1930_v40  ;;  %v1988_v36 = vld [vmem:[#allocation5 + $0x270] sm:$0xff]   ;;  %v1992_v40 = vld [vmem:[#allocation5 + $0x278] sm:$0xff]  }
  0x4a   :  { %1769 = vmatpush3.bf16.msra.mxu1 %v1931_v41  ;;  %1748 = vmatprep.subr.bf16.mxu0 %v1932_v42  ;;  %v1993_v41 = vld [vmem:[#allocation5 + $0x2f8] sm:$0xff]  }
  0x4b   :  { %1770 = vmatprep.subr.bf16.mxu1 %v1933_v43  ;;  %1252 = vmatprep.mubr.bf16.mxu0 %v1563_v8  ;;  %v1994_v42 = vld [vmem:[#allocation5 + $0x238] sm:$0xff]   ;;  %v2022_v8 = vld [vmem:[#allocation5 + $0x328] sm:$0xff]  }
  0x4c   :  { %1292 = vmatprep.mubr.bf16.mxu1 %v1565_v11  ;;  %v1995_v43 = vld [vmem:[#allocation5 + $0x2b8] sm:$0xff]   ;;  %v2025_v11 = vld [vmem:[#allocation5 + $0x3f0] sm:$0xff]  }
  0x4d   :  { %1749 = vmatpush3.bf16.msra.mxu0 %v1934_v44  ;;  %v49_v44 = vld [vmem:[#allocation2 + $0x20] sm:$0xff] }
  0x4e   :  { %1771 = vmatpush3.bf16.msra.mxu1 %v1935_v45  ;;  %1750 = vmatprep.subr.bf16.mxu0 %v1936_v46  ;;  %v50_v45 = vld [vmem:[#allocation2 + $0x28] sm:$0xff]  ;;  %v1566_v46 = vcombine.low %v49_v44, %v49_v44 }
  0x4f   :  { %1772 = vmatprep.subr.bf16.mxu1 %v1937_v47  ;;  %v1567_v47 = vcombine.high %v49_v44, %v49_v44 }
  0x51   :  { %1751 = vmatpush3.bf16.msra.mxu0 %v1938_v48  ;;  %v1568_v48 = vcombine.low %v50_v45, %v50_v45 }
  0x52   :  { %1773 = vmatpush3.bf16.msra.mxu1 %v1939_v49  ;;  %1752 = vmatprep.subr.bf16.mxu0 %v1940_v50  ;;  %v1569_v49 = vcombine.high %v50_v45, %v50_v45  ;;  %v2000_v50 = vld [vmem:[#allocation5 + $0x340] sm:$0xff]  }
  0x53   :  { %1774 = vmatprep.subr.bf16.mxu1 %v1941_v51  ;;  %v2001_v51 = vld [vmem:[#allocation5 + $0x3c0] sm:$0xff]  }
  0x55   :  { %1753 = vmatpush3.bf16.msra.mxu0 %v1942_v52  ;;  %v2002_v52 = vld [vmem:[#allocation5 + $0x300] sm:$0xff]  }
  0x56   :  { %1775 = vmatpush3.bf16.msra.mxu1 %v1943_v53  ;;  %1754 = vmatprep.subr.bf16.mxu0 %v1944_v54  ;;  %v2003_v53 = vld [vmem:[#allocation5 + $0x380] sm:$0xff]   ;;  %v2004_v54 = vld [vmem:[#allocation5 + $0x348] sm:$0xff]  }
  0x57   :  { %1776 = vmatprep.subr.bf16.mxu1 %v1945_v55  ;;  %v2005_v55 = vld [vmem:[#allocation5 + $0x3c8] sm:$0xff]  }
  0x59   :  { %1755 = vmatpush3.bf16.msra.mxu0 %v1946_v56  ;;  %v2006_v56 = vld [vmem:[#allocation5 + $0x308] sm:$0xff]  }
  0x5a   :  { %1777 = vmatpush3.bf16.msra.mxu1 %v1947_v57  ;;  %1756 = vmatprep.subr.bf16.mxu0 %v1948_v58  ;;  %v2007_v57 = vld [vmem:[#allocation5 + $0x388] sm:$0xff]   ;;  %v2008_v58 = vld [vmem:[#allocation5 + $0x350] sm:$0xff]  }
  0x5b   :  { %1778 = vmatprep.subr.bf16.mxu1 %v1949_v59  ;;  %v2009_v59 = vld [vmem:[#allocation5 + $0x3d0] sm:$0xff]  }
  0x5d   :  { %1757 = vmatpush3.bf16.msra.mxu0 %v1950_v60  ;;  %v2010_v60 = vld [vmem:[#allocation5 + $0x310] sm:$0xff]  }
  0x5e   :  { %1779 = vmatpush3.bf16.msra.mxu1 %v1951_v61  ;;  %1758 = vmatprep.subr.bf16.mxu0 %v1952_v62  ;;  %v2011_v61 = vld [vmem:[#allocation5 + $0x390] sm:$0xff]   ;;  %v2012_v62 = vld [vmem:[#allocation5 + $0x358] sm:$0xff]  }
  0x5f   :  { %1780 = vmatprep.subr.bf16.mxu1 %v1953_v63  ;;  %v2013_v63 = vld [vmem:[#allocation5 + $0x3d8] sm:$0xff]  }
  0x61   :  { %1759 = vmatpush3.bf16.msra.mxu0 %v1954_v0  ;;  %v2014_v0 = vld [vmem:[#allocation5 + $0x318] sm:$0xff]  }
  0x62   :  { %1781 = vmatpush3.bf16.msra.mxu1 %v1955_v1  ;;  %1760 = vmatprep.subr.bf16.mxu0 %v1956_v2  ;;  %v2015_v1 = vld [vmem:[#allocation5 + $0x398] sm:$0xff]   ;;  %v2016_v2 = vld [vmem:[#allocation5 + $0x360] sm:$0xff]  }
  0x63   :  { %1782 = vmatprep.subr.bf16.mxu1 %v1957_v3  ;;  %v2017_v3 = vld [vmem:[#allocation5 + $0x3e0] sm:$0xff]  }
  0x65   :  { %1761 = vmatpush3.bf16.msra.mxu0 %v1958_v4  ;;  %v2018_v4 = vld [vmem:[#allocation5 + $0x320] sm:$0xff]  }
  0x66   :  { %1783 = vmatpush3.bf16.msra.mxu1 %v1959_v5  ;;  %1790 = vmatprep.subr.bf16.mxu0 %v1964_v12  ;;  %v2019_v5 = vld [vmem:[#allocation5 + $0x3a0] sm:$0xff]   ;;  %v2026_v12 = vld [vmem:[#allocation5 + $0x330] sm:$0xff]  }
  0x67   :  { %1812 = vmatprep.subr.bf16.mxu1 %v1965_v13  ;;  %v2027_v13 = vld [vmem:[#allocation5 + $0x3b0] sm:$0xff]  }
  0x68   :  { %1253 = vmatmul.mubr.bf16.vlgmr.msra.gmra.mrb[4].mxu0 %v1562_v7  ;;  %v2021_v7 = vld [vmem:[#allocation5 + $0x3e8] sm:$0xff]  }
  0x69   :  { %1293 = vmatmul.mubr.bf16.vlgmr.msra.gmra.mrb[4].mxu1 %v1564_v10  ;;  %1791 = vmatpush3.bf16.msra.mxu0 %v1966_v14  ;;  %v2024_v10 = vld [vmem:[#allocation5 + $0x370] sm:$0xff]   ;;  %v2028_v14 = vld [vmem:[#allocation5 + $0x378] sm:$0xff]  }
  0x6a   :  { %1813 = vmatpush3.bf16.msra.mxu1 %v1967_v15  ;;  %1792 = vmatprep.subr.bf16.mxu0 %v1968_v16  ;;  %v2029_v15 = vld [vmem:[#allocation5 + $0x3f8] sm:$0xff]  }
  0x6b   :  { %1814 = vmatprep.subr.bf16.mxu1 %v1969_v17  ;;  %1332 = vmatprep.mubr.bf16.mxu0 %v1567_v47  ;;  %v2030_v16 = vld [vmem:[#allocation5 + $0x338] sm:$0xff]  }
  0x6c   :  { %1372 = vmatprep.mubr.bf16.mxu1 %v1569_v49  ;;  %v2031_v17 = vld [vmem:[#allocation5 + $0x3b8] sm:$0xff]  }
  0x6d   :  { %1793 = vmatpush3.bf16.msra.mxu0 %v1970_v18  ;;  %v51_v18 = vld [vmem:[#allocation2 + $0x30] sm:$0xff] }
  0x6e   :  { %1815 = vmatpush3.bf16.msra.mxu1 %v1971_v19  ;;  %1794 = vmatprep.subr.bf16.mxu0 %v1972_v20  ;;  %v52_v19 = vld [vmem:[#allocation2 + $0x38] sm:$0xff]  ;;  %v1570_v20 = vcombine.low %v51_v18, %v51_v18 }
  0x6f   :  { %1816 = vmatprep.subr.bf16.mxu1 %v1973_v21  ;;  %v1571_v21 = vcombine.high %v51_v18, %v51_v18 }
  0x71   :  { %1795 = vmatpush3.bf16.msra.mxu0 %v1974_v22  ;;  %v1572_v22 = vcombine.low %v52_v19, %v52_v19 }
  0x72   :  { %1817 = vmatpush3.bf16.msra.mxu1 %v1975_v23  ;;  %1796 = vmatprep.subr.bf16.mxu0 %v1976_v24  ;;  %v1573_v23 = vcombine.high %v52_v19, %v52_v19  ;;  %v2112_v24 = vmov 0.0  }
  0x73   :  { %1818 = vmatprep.subr.bf16.mxu1 %v1977_v25 }
  0x75   :  { %1797 = vmatpush3.bf16.msra.mxu0 %v1978_v26 }
  0x76   :  { %1819 = vmatpush3.bf16.msra.mxu1 %v1979_v27  ;;  %1798 = vmatprep.subr.bf16.mxu0 %v1980_v28  ;;  %v1557_v27 = vld [vmem:[%s2191_s2] ss:$0 sm:$0xff] }
  0x77   :  { %1820 = vmatprep.subr.bf16.mxu1 %v1981_v29 }
  0x79   :  { %1799 = vmatpush3.bf16.msra.mxu0 %v1982_v30 }
  0x7a   :  { %1821 = vmatpush3.bf16.msra.mxu1 %v1983_v31  ;;  %1800 = vmatprep.subr.bf16.mxu0 %v1984_v32 }
  0x7b   :  { %1822 = vmatprep.subr.bf16.mxu1 %v1985_v33 }
  0x7d   :  { %1801 = vmatpush3.bf16.msra.mxu0 %v1986_v34 }
  0x7e   :  { %1823 = vmatpush3.bf16.msra.mxu1 %v1987_v35  ;;  %1802 = vmatprep.subr.bf16.mxu0 %v1988_v36 }
  0x7f   :  { %1824 = vmatprep.subr.bf16.mxu1 %v1989_v37 }
  0x81   :  { %1803 = vmatpush3.bf16.msra.mxu0 %v1990_v38 }
  0x82   :  { %1825 = vmatpush3.bf16.msra.mxu1 %v1991_v39  ;;  %1804 = vmatprep.subr.bf16.mxu0 %v1992_v40 }
  0x83   :  { %1826 = vmatprep.subr.bf16.mxu1 %v1993_v41 }
  0x85   :  { %1805 = vmatpush3.bf16.msra.mxu0 %v1994_v42 }
  0x86   :  { %1827 = vmatpush3.bf16.msra.mxu1 %v1995_v43  ;;  %1834 = vmatprep.subr.bf16.mxu0 %v2000_v50 }
  0x87   :  { %1856 = vmatprep.subr.bf16.mxu1 %v2001_v51 }
  0x88   :  { %1333 = vmatmul.mubr.bf16.vlgmr.msra.gmra.mrb[8].mxu0 %v1566_v46 }
  0x89   :  { %1373 = vmatmul.mubr.bf16.vlgmr.msra.gmra.mrb[8].mxu1 %v1568_v48  ;;  %1835 = vmatpush3.bf16.msra.mxu0 %v2002_v52 }
  0x8a   :  { %1857 = vmatpush3.bf16.msra.mxu1 %v2003_v53  ;;  %1836 = vmatprep.subr.bf16.mxu0 %v2004_v54 }
  0x8b   :  { %1858 = vmatprep.subr.bf16.mxu1 %v2005_v55  ;;  %1412 = vmatprep.mubr.bf16.mxu0 %v1571_v21 }
  0x8c   :  { %1452 = vmatprep.mubr.bf16.mxu1 %v1573_v23 }
  0x8d   :  { %1837 = vmatpush3.bf16.msra.mxu0 %v2006_v56 }
  0x8e   :  { %1859 = vmatpush3.bf16.msra.mxu1 %v2007_v57  ;;  %1838 = vmatprep.subr.bf16.mxu0 %v2008_v58 }
  0x8f   :  { %1860 = vmatprep.subr.bf16.mxu1 %v2009_v59 }
  0x91   :  { %1839 = vmatpush3.bf16.msra.mxu0 %v2010_v60 }
  0x92   :  { %1861 = vmatpush3.bf16.msra.mxu1 %v2011_v61  ;;  %1840 = vmatprep.subr.bf16.mxu0 %v2012_v62 }
  0x93   :  { %1862 = vmatprep.subr.bf16.mxu1 %v2013_v63 }
  0x95   :  { %1841 = vmatpush3.bf16.msra.mxu0 %v2014_v0 }
  0x96   :  { %1863 = vmatpush3.bf16.msra.mxu1 %v2015_v1  ;;  %1842 = vmatprep.subr.bf16.mxu0 %v2016_v2 }
  0x97   :  { %1864 = vmatprep.subr.bf16.mxu1 %v2017_v3 }
  0x99   :  { %1843 = vmatpush3.bf16.msra.mxu0 %v2018_v4 }
  0x9a   :  { %1865 = vmatpush3.bf16.msra.mxu1 %v2019_v5  ;;  %1844 = vmatprep.subr.bf16.mxu0 %v2020_v6 }
  0x9b   :  { %1866 = vmatprep.subr.bf16.mxu1 %v2021_v7 }
  0x9d   :  { %1845 = vmatpush3.bf16.msra.mxu0 %v2022_v8 }
  0x9e   :  { %1867 = vmatpush3.bf16.msra.mxu1 %v2023_v9  ;;  %1846 = vmatprep.subr.bf16.mxu0 %v2024_v10 }
  0x9f   :  { %1868 = vmatprep.subr.bf16.mxu1 %v2025_v11  ;;  %v1461_v11 = vld [vmem:[%s2192_s3] sm:$0xff] }
  0xa1   :  { %1847 = vmatpush3.bf16.msra.mxu0 %v2026_v12  ;;  %v1532_v12 = vlaneseq }
  0xa2   :  { %1869 = vmatpush3.bf16.msra.mxu1 %v2027_v13  ;;  %1848 = vmatprep.subr.bf16.mxu0 %v2028_v14 }
  0xa3   :  { %1870 = vmatprep.subr.bf16.mxu1 %v2029_v15  ;;  %v1533_v13 = vand.u32 127, %v1532_v12 }
  0xa5   :  { %1849 = vmatpush3.bf16.msra.mxu0 %v2030_v16  ;;  %vm1537_vm1 = vcmp.lt.s32.totalorder %v1533_v13, 8 }
  0xa6   :  { %1871 = vmatpush3.bf16.msra.mxu1 %v2031_v17  ;;  %1880 = vmatprep.subr.mxu0 %v2112_v24 }
  0xa8   :  { %1413 = vmatmul.mubr.bf16.vlgmr.msra.gmra.mrb[12].mxu0 %v1570_v20 }
  0xa9   :  { %1453 = vmatmul.mubr.bf16.vlgmr.msra.gmra.mrb[12].mxu1 %v1572_v22  ;;  %1882 = vmatprep.mubr.msk.f32.mxu0 %vm2113_vm0, %v2112_v24 }
 0x11b   :  { %v1718_v25 = vpop.f32.mrb[0].mxu0 }
 0x11c   :  { %v1740_v26 = vpop.f32.mrb[0].mxu1  ;;  %v1719_v28 = vpop.f32.mrb[1].mxu0 }
 0x11d   :  { %v1741_v29 = vpop.f32.mrb[1].mxu1  ;;  %v1720_v30 = vadd.f32 %v1719_v28, %v1718_v25  ;;  %v1721_v32 = vpop.f32.mrb[2].mxu0 }
 0x11e   :  { %v1742_v31 = vadd.f32 %v1741_v29, %v1740_v26  ;;  %v1743_v33 = vpop.f32.mrb[2].mxu1  ;;  %v1722_v34 = vpop.f32.mrb[3].mxu0 }
 0x11f   :  { %v1744_v35 = vpop.f32.mrb[3].mxu1  ;;  %v1175_v36 = vadd.f32 %v1720_v30, %v1557_v27 }
 0x121   :  { %v1215_v37 = vadd.f32 %v1742_v31, %v1175_v36 }
 0x13b   :  { %v1762_v38 = vpop.f32.mrb[4].mxu0 }
 0x13c   :  { %v1784_v39 = vpop.f32.mrb[4].mxu1  ;;  %v1763_v40 = vpop.f32.mrb[5].mxu0 }
 0x13d   :  { %v1785_v41 = vpop.f32.mrb[5].mxu1  ;;  %v1764_v42 = vadd.f32 %v1763_v40, %v1762_v38  ;;  %v1765_v44 = vpop.f32.mrb[6].mxu0 }
 0x13e   :  { %v1786_v43 = vadd.f32 %v1785_v41, %v1784_v39  ;;  %v1787_v45 = vpop.f32.mrb[6].mxu1  ;;  %v1766_v46 = vpop.f32.mrb[7].mxu0 }
 0x13f   :  { %v1788_v47 = vpop.f32.mrb[7].mxu1  ;;  %v1255_v48 = vadd.f32 %v1764_v42, %v1215_v37 }
 0x141   :  { %v1295_v49 = vadd.f32 %v1786_v43, %v1255_v48 }
 0x15b   :  { %v1806_v50 = vpop.f32.mrb[8].mxu0 }
 0x15c   :  { %v1828_v51 = vpop.f32.mrb[8].mxu1  ;;  %v1807_v52 = vpop.f32.mrb[9].mxu0 }
 0x15d   :  { %v1808_v53 = vadd.f32 %v1807_v52, %v1806_v50  ;;  %v1829_v54 = vpop.f32.mrb[9].mxu1  ;;  %v1809_v55 = vpop.f32.mrb[10].mxu0 }
 0x15e   :  { %v1830_v56 = vadd.f32 %v1829_v54, %v1828_v51  ;;  %v1831_v57 = vpop.f32.mrb[10].mxu1  ;;  %v1810_v58 = vpop.f32.mrb[11].mxu0 }
 0x15f   :  { %v1335_v59 = vadd.f32 %v1808_v53, %v1295_v49  ;;  %v1832_v60 = vpop.f32.mrb[11].mxu1 }
 0x161   :  { %v1375_v61 = vadd.f32 %v1830_v56, %v1335_v59 }
 0x17b   :  { %v1850_v62 = vpop.f32.mrb[12].mxu0 }
 0x17c   :  { %v1872_v63 = vpop.f32.mrb[12].mxu1  ;;  %v1851_v0 = vpop.f32.mrb[13].mxu0 }
 0x17d   :  { %v1852_v1 = vadd.f32 %v1851_v0, %v1850_v62  ;;  %v1873_v2 = vpop.f32.mrb[13].mxu1  ;;  %v1853_v3 = vpop.f32.mrb[14].mxu0 }
 0x17e   :  { %v1874_v4 = vadd.f32 %v1873_v2, %v1872_v63  ;;  %v1875_v5 = vpop.f32.mrb[14].mxu1  ;;  %v1854_v6 = vpop.f32.mrb[15].mxu0 }
 0x17f   :  { %v1415_v7 = vadd.f32 %v1852_v1, %v1375_v61  ;;  %v1876_v8 = vpop.f32.mrb[15].mxu1 }
 0x181   :  { %v1455_v9 = vadd.f32 %v1874_v4, %v1415_v7 }
 0x183   :  { %v1460_v10 = vmax.f32 %v1455_v9, 0.0 }
 0x185   :  { %1881 = vmatpush3.xpose.msra.mxu0 %v1460_v10 }
 0x188   :  { %1883 = vmatmul.mubr.f32.vlgmr.msra.gmra.mrb[16].mxu0 %v1461_v11 }
 0x25b   :  { %v1528_v14 = vpop.f32.mrb[16].mxu0 }
 0x25c   :  { %v1538_v15 = vsel %vm1537_vm1, %v1528_v14, -inf  ;;  %v1884_v16 = vpop.f32.mrb[17].mxu0 }
 0x25d   :  { %1540 = vst.msk [vmem:[#allocation7] sm:$0x1] %vm1539_vm2, %v1538_v15 }
 0x25e   :  { %2091 = shalt.err (!%p2088_p6)
}
 0x25f   :  { %s2092_s21 = scalar_lea.hbm %s2193_s4, 16 }
 0x260   :  { %p2093_p7 = scmp.ne.s32.totalorder %s2193_s4, %s2092_s21  ;;  %p2096_p8 = scmp.lt.u32.totalorder %s2092_s21, %s2193_s4 }
 0x262   :  { %p2098_p9 = pnand %p2096_p8, %p2093_p7 }
 0x264   :  { %2101 = shalt.err (!%p2098_p9)
}
 0x265   :  { %1550 = dma.vmem_to_hbm [thread:$0]  %s1548_s17, 16, %s2193_s4, [#allocation4]  }
 0x266   :  { %2106 = dma.done.wait [#allocation4], 16  }
 0x267   :  { %2107 = vsyncadd [#allocation4], 4294967280 }
 0x268   :  { %1554 = vsyncpa [#allocation3], 1 }
 0x269   :  { %1555 = vsyncpa [#allocation6], 1 }
 0x26a   :  { %1556 = vsyncpa [#allocation4], 1 }

</bundles_post_ra>
